<compile_context>
chip_gen: v5e
topology: v5e:2x2
jax: 0.10.0
libtpu: 0.0.40
codegen_flags: <defaults>
</compile_context>

<pallas_src>
import functools

import jax
import jax.numpy as jnp
import numpy as np
from jax import lax
from jax.experimental import pallas as pl
from jax.experimental.pallas import tpu as pltpu


def _res_block2_kernel(x_ref, w1_ref, b1_ref, w2_ref, b2_ref, alpha_ref,
                       o_ref, pad_ref, im2col_ref, *, W, P):
    # x_ref     : (R, HW)        R = images_per_step * C rows (sublane-packed batch)
    # w{1,2}_ref: (R, 9*R)       block-diagonal, tap-major weights (see wrapper)
    # b{1,2}_ref: (R, 1)
    # alpha_ref : (1,) f32 SMEM  PReLU slope (runtime scalar)
    # o_ref     : (R, HW)
    # pad_ref   : (R, HW + 2P)   flat image rows with a zero halo of P lanes per side
    # im2col_ref: (9*R, HW)      packed tap strip fed to a single MXU dot per conv
    R, HW = o_ref.shape

    x = x_ref[...]                                            # (R, HW) f32

    # Zero only the two halo strips once per grid step (interiors are always fully
    # overwritten; im2col / interior stores never touch the halo, so the persistent
    # scratch stays safe under "parallel" multi-core grid sharding).
    pad_ref[:, 0:P] = jnp.zeros((R, P), jnp.float32)
    pad_ref[:, P + HW:P + HW + P] = jnp.zeros((R, P), jnp.float32)

    # Horizontal wrap masks.  With a flat zero halo of >= W+1 lanes every vertical
    # out-of-image tap already reads zeros; only ox = +/-1 taps that would wrap
    # across a row boundary need masking.
    col = lax.broadcasted_iota(jnp.int32, (1, HW), 1) % W
    mask_l = col >= 1          # left  neighbour (ox = -1) is in-image
    mask_r = col <= W - 2      # right neighbour (ox = +1) is in-image

    def conv3x3(w, b):
        # Build the im2col strip: 9 shifted/masked copies of the interior, each an
        # aligned full-(R x HW) store (row offsets are multiples of 8 sublanes,
        # full 256-lane width).  Then a single (R, 9R) x (9R, HW) MXU dot.
        for k in range(9):
            oy, ox = k // 3 - 1, k % 3 - 1
            start = P + oy * W + ox
            t = pad_ref[:, start:start + HW]                  # one shifted tap read
            if ox == -1:
                t = jnp.where(mask_l, t, 0.0)
            elif ox == 1:
                t = jnp.where(mask_r, t, 0.0)
            im2col_ref[k * R:(k + 1) * R, :] = t
        return jnp.dot(w, im2col_ref[...],
                       preferred_element_type=jnp.float32) + b

    alpha = alpha_ref[0]

    # ---- conv1 + PReLU ----
    pad_ref[:, P:P + HW] = x
    y = conv3x3(w1_ref[...], b1_ref[...])
    # TODO(synk): the source calls F.prelu without its required weight argument
    # (invalid PyTorch); we use nn.PReLU's default single slope (0.25), passed in
    # as a runtime SMEM scalar so a traced/learned slope also works.
    y = jnp.where(y > 0, y, alpha * y)

    # ---- conv2 + residual add + ReLU ----
    pad_ref[:, P:P + HW] = y
    z = conv3x3(w2_ref[...], b2_ref[...])
    o_ref[...] = jnp.maximum(z + x, 0.0).astype(o_ref.dtype)


def res_block2(x_nchw, w1_hwio, b1, alpha, w2_hwio, b2):
    """x_nchw: (N, C, H, W); weights HWIO (3, 3, Cin, Cout); returns NCHW."""
    N, Cin, H, W = x_nchw.shape
    Cout = w1_hwio.shape[-1]
    assert Cin == Cout, "residual add requires in_channels == out_channels"
    HW = H * W
    assert HW % 128 == 0, "flattened spatial must be lane-aligned"

    NB = 2                                    # images packed per grid step
    assert N % NB == 0, "batch must be a multiple of images-per-step (2)"
    R = NB * Cin                              # sublane rows per step (8 here)
    assert R % 8 == 0, "packed rows must fill the 8 f32 sublanes"
    P = ((W + 1 + 127) // 128) * 128          # flat halo width, lane-aligned

    # NCHW -> (N*C, H*W): pure reshape, no transpose / pad.  Rows n*C + c.
    x = x_nchw.reshape(N * Cin, HW).astype(jnp.float32)

    # HWIO (3,3,Cin,Cout) -> block-diagonal, tap-major (R, 9*R):
    #   Wbd[n*Cout+co, k*(NB*Cin)+m*Cin+ci] = W[k, co, ci] if n == m else 0
    # so one dot against the tap-major im2col produces both packed images.
    def block_diag_weights(w_hwio):
        w_tap = jnp.transpose(w_hwio, (0, 1, 3, 2)).reshape(9, Cout, Cin)
        w_tap = w_tap.astype(jnp.float32)
        eye = jnp.eye(NB, dtype=jnp.float32)
        wbd = jnp.einsum('nm,koi->nokmi', eye, w_tap)
        return wbd.reshape(NB * Cout, 9 * NB * Cin)

    w1bd = block_diag_weights(w1_hwio)
    w2bd = block_diag_weights(w2_hwio)
    b1bd = jnp.tile(b1.reshape(1, Cout), (NB, 1)).reshape(R, 1).astype(jnp.float32)
    b2bd = jnp.tile(b2.reshape(1, Cout), (NB, 1)).reshape(R, 1).astype(jnp.float32)
    alpha_arr = jnp.asarray(alpha, jnp.float32).reshape(1)

    kernel = functools.partial(_res_block2_kernel, W=W, P=P)

    out = pl.pallas_call(
        kernel,
        out_shape=jax.ShapeDtypeStruct((N * Cout, HW), jnp.float32),
        grid_spec=pltpu.PrefetchScalarGridSpec(
            num_scalar_prefetch=0,
            grid=(N // NB,),
            in_specs=[
                pl.BlockSpec((R, HW), lambda g: (g, 0)),
                pl.BlockSpec(w1bd.shape, lambda g: (0, 0)),
                pl.BlockSpec((R, 1), lambda g: (0, 0)),
                pl.BlockSpec(w2bd.shape, lambda g: (0, 0)),
                pl.BlockSpec((R, 1), lambda g: (0, 0)),
                pl.BlockSpec(memory_space=pltpu.MemorySpace.SMEM),   # alpha scalar
            ],
            out_specs=pl.BlockSpec((R, HW), lambda g: (g, 0)),
            scratch_shapes=[
                pltpu.VMEM((R, HW + 2 * P), jnp.float32),      # zero-halo image rows
                pltpu.VMEM((9 * R, HW), jnp.float32),          # packed im2col strip
            ],
        ),
        compiler_params=pltpu.CompilerParams(
            dimension_semantics=("parallel",),
        ),
    )(x, w1bd, b1bd, w2bd, b2bd, alpha_arr)

    return out.reshape(N, Cout, H, W)


def _reference(x_nchw, w1_hwio, b1, alpha, w2_hwio, b2):
    """Pure-JAX reference matching the PyTorch forward semantics (NCHW)."""
    dn = ('NCHW', 'HWIO', 'NCHW')
    x = x_nchw.astype(jnp.float32)
    y = lax.conv_general_dilated(x, w1_hwio, (1, 1), 'SAME', dimension_numbers=dn)
    y = y + b1.reshape(1, -1, 1, 1)
    y = jnp.where(y > 0, y, alpha * y)                  # PReLU
    z = lax.conv_general_dilated(y, w2_hwio, (1, 1), 'SAME', dimension_numbers=dn)
    z = z + b2.reshape(1, -1, 1, 1)
    return jnp.maximum(z + x, 0.0)                      # residual + ReLU


if __name__ == "__main__":
    N, C, H, W = 2, 4, 16, 16
    key = jax.random.PRNGKey(0)
    kx, kw1, kb1, kw2, kb2 = jax.random.split(key, 5)

    x = jax.random.normal(kx, (N, C, H, W), jnp.float32)          # NCHW like PyTorch
    w1 = jax.random.normal(kw1, (3, 3, C, C), jnp.float32) * 0.1  # HWIO
    b1 = jax.random.normal(kb1, (C,), jnp.float32) * 0.1
    w2 = jax.random.normal(kw2, (3, 3, C, C), jnp.float32) * 0.1
    b2 = jax.random.normal(kb2, (C,), jnp.float32) * 0.1
    alpha = 0.25                                                  # PyTorch PReLU default

    out = jax.block_until_ready(res_block2(x, w1, b1, alpha, w2, b2))
    ref = jax.block_until_ready(_reference(x, w1, b1, alpha, w2, b2))
    np.testing.assert_allclose(np.asarray(out), np.asarray(ref),
                               rtol=1e-4, atol=1e-4)

    print("KERNEL_OK")
</pallas_src>

<mosaic_0001>
module attributes {stable_mosaic.version = 11 : i64} {
  func.func @_res_block2_kernel(%arg0: i32, %arg1: memref<8x256xf32, #tpu.memory_space<vmem>>, %arg2: memref<8x72xf32, #tpu.memory_space<vmem>>, %arg3: memref<8x1xf32, #tpu.memory_space<vmem>>, %arg4: memref<8x72xf32, #tpu.memory_space<vmem>>, %arg5: memref<8x1xf32, #tpu.memory_space<vmem>>, %arg6: memref<1xf32, #tpu.memory_space<smem>>, %arg7: memref<8x256xf32, #tpu.memory_space<vmem>>, %arg8: memref<8x512xf32, #tpu.memory_space<vmem>>, %arg9: memref<72x256xf32, #tpu.memory_space<vmem>>) attributes {dimension_semantics = [#tpu.dimension_semantics<parallel>], iteration_bounds = array<i64: 1>, scalar_prefetch = 0 : i64, scratch_operands = 2 : i64, tpu.core_type = #tpu.core_type<tc>, window_params = [{transform_indices = @transform_0, window_bounds = array<i64: 8, 256>}, {pipeline_mode = #tpu.pipeline_mode<synchronous>, transform_indices = @transform_1, window_bounds = array<i64: 8, 72>}, {pipeline_mode = #tpu.pipeline_mode<synchronous>, transform_indices = @transform_2, window_bounds = array<i64: 8, 1>}, {pipeline_mode = #tpu.pipeline_mode<synchronous>, transform_indices = @transform_3, window_bounds = array<i64: 8, 72>}, {pipeline_mode = #tpu.pipeline_mode<synchronous>, transform_indices = @transform_4, window_bounds = array<i64: 8, 1>}, {transform_indices = @transform_5, window_bounds = array<i64: 1>}, {transform_indices = @transform_6, window_bounds = array<i64: 8, 256>}]} {
    %c0 = arith.constant 0 : index
    %c0_0 = arith.constant 0 : index
    %0 = vector.load %arg1[%c0, %c0_0] : memref<8x256xf32, #tpu.memory_space<vmem>>, vector<8x256xf32>
    %cst = arith.constant 0.000000e+00 : f32
    %1 = vector.broadcast %cst : f32 to vector<8x128xf32>
    %c0_1 = arith.constant 0 : index
    %c0_2 = arith.constant 0 : index
    %2 = vector.load %arg8[%c0_1, %c0_2] : memref<8x512xf32, #tpu.memory_space<vmem>>, vector<8x128xf32>
    tpu.vector_store %arg8[%c0_1, %c0_2], %1 {strides = array<i32>} : memref<8x512xf32, #tpu.memory_space<vmem>>, vector<8x128xf32>,
    %cst_3 = arith.constant 0.000000e+00 : f32
    %3 = vector.broadcast %cst_3 : f32 to vector<8x128xf32>
    %c0_4 = arith.constant 0 : index
    %c384 = arith.constant 384 : index
    %4 = vector.load %arg8[%c0_4, %c384] : memref<8x512xf32, #tpu.memory_space<vmem>>, vector<8x128xf32>
    tpu.vector_store %arg8[%c0_4, %c384], %3 {strides = array<i32>} : memref<8x512xf32, #tpu.memory_space<vmem>>, vector<8x128xf32>,
    %5 = tpu.iota {dimensions = array<i32: 1>} : vector<1x256xi32>
    %c16_i32 = arith.constant 16 : i32
    %c0_i32 = arith.constant 0 : i32
    %6 = arith.cmpi eq, %c16_i32, %c0_i32 : i32
    %c1_i32 = arith.constant 1 : i32
    %7 = arith.select %6, %c1_i32, %c16_i32 : i32
    %8 = vector.broadcast %7 : i32 to vector<1x256xi32>
    %9 = arith.remsi %5, %8 : vector<1x256xi32>
    %c0_i32_5 = arith.constant 0 : i32
    %10 = vector.broadcast %c0_i32_5 : i32 to vector<1x256xi32>
    %11 = arith.cmpi ne, %9, %10 : vector<1x256xi32>
    %c0_i32_6 = arith.constant 0 : i32
    %12 = vector.broadcast %c0_i32_6 : i32 to vector<1x256xi32>
    %13 = arith.cmpi slt, %9, %12 : vector<1x256xi32>
    %c0_i32_7 = arith.constant 0 : i32
    %14 = arith.cmpi slt, %7, %c0_i32_7 : i32
    %15 = vector.broadcast %14 : i1 to vector<1x256xi1>
    %16 = vector.broadcast %15 : vector<1x256xi1> to vector<1x256xi1>
    %17 = arith.xori %13, %16 : vector<1x256xi1>
    %18 = arith.andi %17, %11 : vector<1x256xi1>
    %19 = vector.broadcast %7 : i32 to vector<1x256xi32>
    %20 = arith.addi %9, %19 : vector<1x256xi32>
    %21 = arith.select %18, %20, %9 : vector<1x256xi1>, vector<1x256xi32>
    %c1_i32_8 = arith.constant 1 : i32
    %22 = vector.broadcast %c1_i32_8 : i32 to vector<1x256xi32>
    %23 = arith.cmpi sge, %21, %22 : vector<1x256xi32>
    %c14_i32 = arith.constant 14 : i32
    %24 = vector.broadcast %c14_i32 : i32 to vector<1x256xi32>
    %25 = arith.cmpi sle, %21, %24 : vector<1x256xi32>
    %c0_9 = arith.constant 0 : index
    %26 = memref.load %arg6[%c0_9] : memref<1xf32, #tpu.memory_space<smem>>
    %c0_10 = arith.constant 0 : index
    %c128 = arith.constant 128 : index
    %27 = vector.load %arg8[%c0_10, %c128] : memref<8x512xf32, #tpu.memory_space<vmem>>, vector<8x256xf32>
    tpu.vector_store %arg8[%c0_10, %c128], %0 {strides = array<i32>} : memref<8x512xf32, #tpu.memory_space<vmem>>, vector<8x256xf32>,
    %c0_11 = arith.constant 0 : index
    %c0_12 = arith.constant 0 : index
    %28 = vector.load %arg2[%c0_11, %c0_12] : memref<8x72xf32, #tpu.memory_space<vmem>>, vector<8x72xf32>
    %c0_13 = arith.constant 0 : index
    %c0_14 = arith.constant 0 : index
    %29 = vector.load %arg3[%c0_13, %c0_14] : memref<8x1xf32, #tpu.memory_space<vmem>>, vector<8x1xf32>
    %c0_15 = arith.constant 0 : index
    %c111 = arith.constant 111 : index
    %30 = vector.load %arg8[%c0_15, %c111] : memref<8x512xf32, #tpu.memory_space<vmem>>, vector<8x256xf32>
    %cst_16 = arith.constant 0.000000e+00 : f32
    %31 = vector.shape_cast %23 : vector<1x256xi1> to vector<1x256xi1>
    %32 = vector.broadcast %31 : vector<1x256xi1> to vector<8x256xi1>
    %33 = vector.broadcast %cst_16 : f32 to vector<8x256xf32>
    %34 = arith.select %32, %30, %33 : vector<8x256xi1>, vector<8x256xf32>
    %c0_17 = arith.constant 0 : index
    %c0_18 = arith.constant 0 : index
    %35 = vector.load %arg9[%c0_17, %c0_18] : memref<72x256xf32, #tpu.memory_space<vmem>>, vector<8x256xf32>
    tpu.vector_store %arg9[%c0_17, %c0_18], %34 {strides = array<i32>} : memref<72x256xf32, #tpu.memory_space<vmem>>, vector<8x256xf32>,
    %c0_19 = arith.constant 0 : index
    %c112 = arith.constant 112 : index
    %36 = vector.load %arg8[%c0_19, %c112] : memref<8x512xf32, #tpu.memory_space<vmem>>, vector<8x256xf32>
    %c8 = arith.constant 8 : index
    %c0_20 = arith.constant 0 : index
    %37 = vector.load %arg9[%c8, %c0_20] : memref<72x256xf32, #tpu.memory_space<vmem>>, vector<8x256xf32>
    tpu.vector_store %arg9[%c8, %c0_20], %36 {strides = array<i32>} : memref<72x256xf32, #tpu.memory_space<vmem>>, vector<8x256xf32>,
    %c0_21 = arith.constant 0 : index
    %c113 = arith.constant 113 : index
    %38 = vector.load %arg8[%c0_21, %c113] : memref<8x512xf32, #tpu.memory_space<vmem>>, vector<8x256xf32>
    %cst_22 = arith.constant 0.000000e+00 : f32
    %39 = vector.shape_cast %25 : vector<1x256xi1> to vector<1x256xi1>
    %40 = vector.broadcast %39 : vector<1x256xi1> to vector<8x256xi1>
    %41 = vector.broadcast %cst_22 : f32 to vector<8x256xf32>
    %42 = arith.select %40, %38, %41 : vector<8x256xi1>, vector<8x256xf32>
    %c16 = arith.constant 16 : index
    %c0_23 = arith.constant 0 : index
    %43 = vector.load %arg9[%c16, %c0_23] : memref<72x256xf32, #tpu.memory_space<vmem>>, vector<8x256xf32>
    tpu.vector_store %arg9[%c16, %c0_23], %42 {strides = array<i32>} : memref<72x256xf32, #tpu.memory_space<vmem>>, vector<8x256xf32>,
    %c0_24 = arith.constant 0 : index
    %c127 = arith.constant 127 : index
    %44 = vector.load %arg8[%c0_24, %c127] : memref<8x512xf32, #tpu.memory_space<vmem>>, vector<8x256xf32>
    %cst_25 = arith.constant 0.000000e+00 : f32
    %45 = vector.shape_cast %23 : vector<1x256xi1> to vector<1x256xi1>
    %46 = vector.broadcast %45 : vector<1x256xi1> to vector<8x256xi1>
    %47 = vector.broadcast %cst_25 : f32 to vector<8x256xf32>
    %48 = arith.select %46, %44, %47 : vector<8x256xi1>, vector<8x256xf32>
    %c24 = arith.constant 24 : index
    %c0_26 = arith.constant 0 : index
    %49 = vector.load %arg9[%c24, %c0_26] : memref<72x256xf32, #tpu.memory_space<vmem>>, vector<8x256xf32>
    tpu.vector_store %arg9[%c24, %c0_26], %48 {strides = array<i32>} : memref<72x256xf32, #tpu.memory_space<vmem>>, vector<8x256xf32>,
    %c0_27 = arith.constant 0 : index
    %c128_28 = arith.constant 128 : index
    %50 = vector.load %arg8[%c0_27, %c128_28] : memref<8x512xf32, #tpu.memory_space<vmem>>, vector<8x256xf32>
    %c32 = arith.constant 32 : index
    %c0_29 = arith.constant 0 : index
    %51 = vector.load %arg9[%c32, %c0_29] : memref<72x256xf32, #tpu.memory_space<vmem>>, vector<8x256xf32>
    tpu.vector_store %arg9[%c32, %c0_29], %50 {strides = array<i32>} : memref<72x256xf32, #tpu.memory_space<vmem>>, vector<8x256xf32>,
    %c0_30 = arith.constant 0 : index
    %c129 = arith.constant 129 : index
    %52 = vector.load %arg8[%c0_30, %c129] : memref<8x512xf32, #tpu.memory_space<vmem>>, vector<8x256xf32>
    %cst_31 = arith.constant 0.000000e+00 : f32
    %53 = vector.shape_cast %25 : vector<1x256xi1> to vector<1x256xi1>
    %54 = vector.broadcast %53 : vector<1x256xi1> to vector<8x256xi1>
    %55 = vector.broadcast %cst_31 : f32 to vector<8x256xf32>
    %56 = arith.select %54, %52, %55 : vector<8x256xi1>, vector<8x256xf32>
    %c40 = arith.constant 40 : index
    %c0_32 = arith.constant 0 : index
    %57 = vector.load %arg9[%c40, %c0_32] : memref<72x256xf32, #tpu.memory_space<vmem>>, vector<8x256xf32>
    tpu.vector_store %arg9[%c40, %c0_32], %56 {strides = array<i32>} : memref<72x256xf32, #tpu.memory_space<vmem>>, vector<8x256xf32>,
    %c0_33 = arith.constant 0 : index
    %c143 = arith.constant 143 : index
    %58 = vector.load %arg8[%c0_33, %c143] : memref<8x512xf32, #tpu.memory_space<vmem>>, vector<8x256xf32>
    %cst_34 = arith.constant 0.000000e+00 : f32
    %59 = vector.shape_cast %23 : vector<1x256xi1> to vector<1x256xi1>
    %60 = vector.broadcast %59 : vector<1x256xi1> to vector<8x256xi1>
    %61 = vector.broadcast %cst_34 : f32 to vector<8x256xf32>
    %62 = arith.select %60, %58, %61 : vector<8x256xi1>, vector<8x256xf32>
    %c48 = arith.constant 48 : index
    %c0_35 = arith.constant 0 : index
    %63 = vector.load %arg9[%c48, %c0_35] : memref<72x256xf32, #tpu.memory_space<vmem>>, vector<8x256xf32>
    tpu.vector_store %arg9[%c48, %c0_35], %62 {strides = array<i32>} : memref<72x256xf32, #tpu.memory_space<vmem>>, vector<8x256xf32>,
    %c0_36 = arith.constant 0 : index
    %c144 = arith.constant 144 : index
    %64 = vector.load %arg8[%c0_36, %c144] : memref<8x512xf32, #tpu.memory_space<vmem>>, vector<8x256xf32>
    %c56 = arith.constant 56 : index
    %c0_37 = arith.constant 0 : index
    %65 = vector.load %arg9[%c56, %c0_37] : memref<72x256xf32, #tpu.memory_space<vmem>>, vector<8x256xf32>
    tpu.vector_store %arg9[%c56, %c0_37], %64 {strides = array<i32>} : memref<72x256xf32, #tpu.memory_space<vmem>>, vector<8x256xf32>,
    %c0_38 = arith.constant 0 : index
    %c145 = arith.constant 145 : index
    %66 = vector.load %arg8[%c0_38, %c145] : memref<8x512xf32, #tpu.memory_space<vmem>>, vector<8x256xf32>
    %cst_39 = arith.constant 0.000000e+00 : f32
    %67 = vector.shape_cast %25 : vector<1x256xi1> to vector<1x256xi1>
    %68 = vector.broadcast %67 : vector<1x256xi1> to vector<8x256xi1>
    %69 = vector.broadcast %cst_39 : f32 to vector<8x256xf32>
    %70 = arith.select %68, %66, %69 : vector<8x256xi1>, vector<8x256xf32>
    %c64 = arith.constant 64 : index
    %c0_40 = arith.constant 0 : index
    %71 = vector.load %arg9[%c64, %c0_40] : memref<72x256xf32, #tpu.memory_space<vmem>>, vector<8x256xf32>
    tpu.vector_store %arg9[%c64, %c0_40], %70 {strides = array<i32>} : memref<72x256xf32, #tpu.memory_space<vmem>>, vector<8x256xf32>,
    %c0_41 = arith.constant 0 : index
    %c0_42 = arith.constant 0 : index
    %72 = vector.load %arg9[%c0_41, %c0_42] : memref<72x256xf32, #tpu.memory_space<vmem>>, vector<72x256xf32>
    %cst_43 = arith.constant dense<0.000000e+00> : vector<8x256xf32>
    %73 = tpu.matmul %28, %72, %cst_43 {dimension_numbers = #tpu.dot_dimension_numbers<[1], [0], [0], [1], [0, 0, 1, 1], [], []>} : vector<8x72xf32>, vector<72x256xf32>, vector<8x256xf32> -> vector<8x256xf32>
    %74 = vector.broadcast %29 : vector<8x1xf32> to vector<8x256xf32>
    %75 = arith.addf %73, %74 : vector<8x256xf32>
    %cst_44 = arith.constant 0.000000e+00 : f32
    %76 = vector.broadcast %cst_44 : f32 to vector<8x256xf32>
    %77 = arith.cmpf ogt, %75, %76 : vector<8x256xf32>
    %78 = vector.broadcast %26 : f32 to vector<8x256xf32>
    %79 = arith.mulf %78, %75 : vector<8x256xf32>
    %80 = arith.select %77, %75, %79 : vector<8x256xi1>, vector<8x256xf32>
    %c0_45 = arith.constant 0 : index
    %c128_46 = arith.constant 128 : index
    %81 = vector.load %arg8[%c0_45, %c128_46] : memref<8x512xf32, #tpu.memory_space<vmem>>, vector<8x256xf32>
    tpu.vector_store %arg8[%c0_45, %c128_46], %80 {strides = array<i32>} : memref<8x512xf32, #tpu.memory_space<vmem>>, vector<8x256xf32>,
    %c0_47 = arith.constant 0 : index
    %c0_48 = arith.constant 0 : index
    %82 = vector.load %arg4[%c0_47, %c0_48] : memref<8x72xf32, #tpu.memory_space<vmem>>, vector<8x72xf32>
    %c0_49 = arith.constant 0 : index
    %c0_50 = arith.constant 0 : index
    %83 = vector.load %arg5[%c0_49, %c0_50] : memref<8x1xf32, #tpu.memory_space<vmem>>, vector<8x1xf32>
    %c0_51 = arith.constant 0 : index
    %c111_52 = arith.constant 111 : index
    %84 = vector.load %arg8[%c0_51, %c111_52] : memref<8x512xf32, #tpu.memory_space<vmem>>, vector<8x256xf32>
    %cst_53 = arith.constant 0.000000e+00 : f32
    %85 = vector.shape_cast %23 : vector<1x256xi1> to vector<1x256xi1>
    %86 = vector.broadcast %85 : vector<1x256xi1> to vector<8x256xi1>
    %87 = vector.broadcast %cst_53 : f32 to vector<8x256xf32>
    %88 = arith.select %86, %84, %87 : vector<8x256xi1>, vector<8x256xf32>
    %c0_54 = arith.constant 0 : index
    %c0_55 = arith.constant 0 : index
    %89 = vector.load %arg9[%c0_54, %c0_55] : memref<72x256xf32, #tpu.memory_space<vmem>>, vector<8x256xf32>
    tpu.vector_store %arg9[%c0_54, %c0_55], %88 {strides = array<i32>} : memref<72x256xf32, #tpu.memory_space<vmem>>, vector<8x256xf32>,
    %c0_56 = arith.constant 0 : index
    %c112_57 = arith.constant 112 : index
    %90 = vector.load %arg8[%c0_56, %c112_57] : memref<8x512xf32, #tpu.memory_space<vmem>>, vector<8x256xf32>
    %c8_58 = arith.constant 8 : index
    %c0_59 = arith.constant 0 : index
    %91 = vector.load %arg9[%c8_58, %c0_59] : memref<72x256xf32, #tpu.memory_space<vmem>>, vector<8x256xf32>
    tpu.vector_store %arg9[%c8_58, %c0_59], %90 {strides = array<i32>} : memref<72x256xf32, #tpu.memory_space<vmem>>, vector<8x256xf32>,
    %c0_60 = arith.constant 0 : index
    %c113_61 = arith.constant 113 : index
    %92 = vector.load %arg8[%c0_60, %c113_61] : memref<8x512xf32, #tpu.memory_space<vmem>>, vector<8x256xf32>
    %cst_62 = arith.constant 0.000000e+00 : f32
    %93 = vector.shape_cast %25 : vector<1x256xi1> to vector<1x256xi1>
    %94 = vector.broadcast %93 : vector<1x256xi1> to vector<8x256xi1>
    %95 = vector.broadcast %cst_62 : f32 to vector<8x256xf32>
    %96 = arith.select %94, %92, %95 : vector<8x256xi1>, vector<8x256xf32>
    %c16_63 = arith.constant 16 : index
    %c0_64 = arith.constant 0 : index
    %97 = vector.load %arg9[%c16_63, %c0_64] : memref<72x256xf32, #tpu.memory_space<vmem>>, vector<8x256xf32>
    tpu.vector_store %arg9[%c16_63, %c0_64], %96 {strides = array<i32>} : memref<72x256xf32, #tpu.memory_space<vmem>>, vector<8x256xf32>,
    %c0_65 = arith.constant 0 : index
    %c127_66 = arith.constant 127 : index
    %98 = vector.load %arg8[%c0_65, %c127_66] : memref<8x512xf32, #tpu.memory_space<vmem>>, vector<8x256xf32>
    %cst_67 = arith.constant 0.000000e+00 : f32
    %99 = vector.shape_cast %23 : vector<1x256xi1> to vector<1x256xi1>
    %100 = vector.broadcast %99 : vector<1x256xi1> to vector<8x256xi1>
    %101 = vector.broadcast %cst_67 : f32 to vector<8x256xf32>
    %102 = arith.select %100, %98, %101 : vector<8x256xi1>, vector<8x256xf32>
    %c24_68 = arith.constant 24 : index
    %c0_69 = arith.constant 0 : index
    %103 = vector.load %arg9[%c24_68, %c0_69] : memref<72x256xf32, #tpu.memory_space<vmem>>, vector<8x256xf32>
    tpu.vector_store %arg9[%c24_68, %c0_69], %102 {strides = array<i32>} : memref<72x256xf32, #tpu.memory_space<vmem>>, vector<8x256xf32>,
    %c0_70 = arith.constant 0 : index
    %c128_71 = arith.constant 128 : index
    %104 = vector.load %arg8[%c0_70, %c128_71] : memref<8x512xf32, #tpu.memory_space<vmem>>, vector<8x256xf32>
    %c32_72 = arith.constant 32 : index
    %c0_73 = arith.constant 0 : index
    %105 = vector.load %arg9[%c32_72, %c0_73] : memref<72x256xf32, #tpu.memory_space<vmem>>, vector<8x256xf32>
    tpu.vector_store %arg9[%c32_72, %c0_73], %104 {strides = array<i32>} : memref<72x256xf32, #tpu.memory_space<vmem>>, vector<8x256xf32>,
    %c0_74 = arith.constant 0 : index
    %c129_75 = arith.constant 129 : index
    %106 = vector.load %arg8[%c0_74, %c129_75] : memref<8x512xf32, #tpu.memory_space<vmem>>, vector<8x256xf32>
    %cst_76 = arith.constant 0.000000e+00 : f32
    %107 = vector.shape_cast %25 : vector<1x256xi1> to vector<1x256xi1>
    %108 = vector.broadcast %107 : vector<1x256xi1> to vector<8x256xi1>
    %109 = vector.broadcast %cst_76 : f32 to vector<8x256xf32>
    %110 = arith.select %108, %106, %109 : vector<8x256xi1>, vector<8x256xf32>
    %c40_77 = arith.constant 40 : index
    %c0_78 = arith.constant 0 : index
    %111 = vector.load %arg9[%c40_77, %c0_78] : memref<72x256xf32, #tpu.memory_space<vmem>>, vector<8x256xf32>
    tpu.vector_store %arg9[%c40_77, %c0_78], %110 {strides = array<i32>} : memref<72x256xf32, #tpu.memory_space<vmem>>, vector<8x256xf32>,
    %c0_79 = arith.constant 0 : index
    %c143_80 = arith.constant 143 : index
    %112 = vector.load %arg8[%c0_79, %c143_80] : memref<8x512xf32, #tpu.memory_space<vmem>>, vector<8x256xf32>
    %cst_81 = arith.constant 0.000000e+00 : f32
    %113 = vector.shape_cast %23 : vector<1x256xi1> to vector<1x256xi1>
    %114 = vector.broadcast %113 : vector<1x256xi1> to vector<8x256xi1>
    %115 = vector.broadcast %cst_81 : f32 to vector<8x256xf32>
    %116 = arith.select %114, %112, %115 : vector<8x256xi1>, vector<8x256xf32>
    %c48_82 = arith.constant 48 : index
    %c0_83 = arith.constant 0 : index
    %117 = vector.load %arg9[%c48_82, %c0_83] : memref<72x256xf32, #tpu.memory_space<vmem>>, vector<8x256xf32>
    tpu.vector_store %arg9[%c48_82, %c0_83], %116 {strides = array<i32>} : memref<72x256xf32, #tpu.memory_space<vmem>>, vector<8x256xf32>,
    %c0_84 = arith.constant 0 : index
    %c144_85 = arith.constant 144 : index
    %118 = vector.load %arg8[%c0_84, %c144_85] : memref<8x512xf32, #tpu.memory_space<vmem>>, vector<8x256xf32>
    %c56_86 = arith.constant 56 : index
    %c0_87 = arith.constant 0 : index
    %119 = vector.load %arg9[%c56_86, %c0_87] : memref<72x256xf32, #tpu.memory_space<vmem>>, vector<8x256xf32>
    tpu.vector_store %arg9[%c56_86, %c0_87], %118 {strides = array<i32>} : memref<72x256xf32, #tpu.memory_space<vmem>>, vector<8x256xf32>,
    %c0_88 = arith.constant 0 : index
    %c145_89 = arith.constant 145 : index
    %120 = vector.load %arg8[%c0_88, %c145_89] : memref<8x512xf32, #tpu.memory_space<vmem>>, vector<8x256xf32>
    %cst_90 = arith.constant 0.000000e+00 : f32
    %121 = vector.shape_cast %25 : vector<1x256xi1> to vector<1x256xi1>
    %122 = vector.broadcast %121 : vector<1x256xi1> to vector<8x256xi1>
    %123 = vector.broadcast %cst_90 : f32 to vector<8x256xf32>
    %124 = arith.select %122, %120, %123 : vector<8x256xi1>, vector<8x256xf32>
    %c64_91 = arith.constant 64 : index
    %c0_92 = arith.constant 0 : index
    %125 = vector.load %arg9[%c64_91, %c0_92] : memref<72x256xf32, #tpu.memory_space<vmem>>, vector<8x256xf32>
    tpu.vector_store %arg9[%c64_91, %c0_92], %124 {strides = array<i32>} : memref<72x256xf32, #tpu.memory_space<vmem>>, vector<8x256xf32>,
    %c0_93 = arith.constant 0 : index
    %c0_94 = arith.constant 0 : index
    %126 = vector.load %arg9[%c0_93, %c0_94] : memref<72x256xf32, #tpu.memory_space<vmem>>, vector<72x256xf32>
    %cst_95 = arith.constant dense<0.000000e+00> : vector<8x256xf32>
    %127 = tpu.matmul %82, %126, %cst_95 {dimension_numbers = #tpu.dot_dimension_numbers<[1], [0], [0], [1], [0, 0, 1, 1], [], []>} : vector<8x72xf32>, vector<72x256xf32>, vector<8x256xf32> -> vector<8x256xf32>
    %128 = vector.broadcast %83 : vector<8x1xf32> to vector<8x256xf32>
    %129 = arith.addf %127, %128 : vector<8x256xf32>
    %130 = arith.addf %129, %0 : vector<8x256xf32>
    %cst_96 = arith.constant 0.000000e+00 : f32
    %131 = vector.broadcast %cst_96 : f32 to vector<8x256xf32>
    %132 = arith.maximumf %130, %131 : vector<8x256xf32>
    %c0_97 = arith.constant 0 : index
    %c0_98 = arith.constant 0 : index
    %133 = vector.load %arg7[%c0_97, %c0_98] : memref<8x256xf32, #tpu.memory_space<vmem>>, vector<8x256xf32>
    tpu.vector_store %arg7[%c0_97, %c0_98], %132 {strides = array<i32>} : memref<8x256xf32, #tpu.memory_space<vmem>>, vector<8x256xf32>,
    return
  }
  func.func @transform_0(%arg0: i32) -> (i32, i32) {
    %c0_i32 = arith.constant 0 : i32
    %c0_i32_0 = arith.constant 0 : i32
    return %arg0, %c0_i32 : i32, i32
  }
  func.func @transform_1(%arg0: i32) -> (i32, i32) {
    %c0_i32 = arith.constant 0 : i32
    %c0_i32_0 = arith.constant 0 : i32
    %c0_i32_1 = arith.constant 0 : i32
    return %c0_i32, %c0_i32_0 : i32, i32
  }
  func.func @transform_2(%arg0: i32) -> (i32, i32) {
    %c0_i32 = arith.constant 0 : i32
    %c0_i32_0 = arith.constant 0 : i32
    %c0_i32_1 = arith.constant 0 : i32
    return %c0_i32, %c0_i32_0 : i32, i32
  }
  func.func @transform_3(%arg0: i32) -> (i32, i32) {
    %c0_i32 = arith.constant 0 : i32
    %c0_i32_0 = arith.constant 0 : i32
    %c0_i32_1 = arith.constant 0 : i32
    return %c0_i32, %c0_i32_0 : i32, i32
  }
  func.func @transform_4(%arg0: i32) -> (i32, i32) {
    %c0_i32 = arith.constant 0 : i32
    %c0_i32_0 = arith.constant 0 : i32
    %c0_i32_1 = arith.constant 0 : i32
    return %c0_i32, %c0_i32_0 : i32, i32
  }
  func.func @transform_5(%arg0: i32) -> i32 {
    %c0_i32 = arith.constant 0 : i32
    %c0_i32_0 = arith.constant 0 : i32
    return %c0_i32 : i32
  }
  func.func @transform_6(%arg0: i32) -> (i32, i32) {
    %c0_i32 = arith.constant 0 : i32
    %c0_i32_0 = arith.constant 0 : i32
    return %arg0, %c0_i32 : i32, i32
  }
}

</mosaic_0001>

<bundles_post_ra>
// kernel: tpu_custom_call.1
= control target key start
LH: loop header
LB: loop body
LE: loop exit
PB: predicated region body
PF: predicated region fallthrough
CT: control target
= control target key end

     0   :  { %12 = vsyncpa [#allocation6], 0  ;;  %s994_s0 = inlined_call_operand.vmem [shape: f32[8,256], index: 0, kind: input, shape index: {}]   ;;  %s995_s1 = inlined_call_operand.hbm [shape: f32[8,72], index: 1, kind: input, shape index: {}]   ;;  %s996_s2 = inlined_call_operand.vmem [shape: f32[8,1], index: 2, kind: input, shape index: {}]   ;;  %s997_s3 = inlined_call_operand.hbm [shape: f32[8,72], index: 3, kind: input, shape index: {}]   ;;  %s998_s4 = inlined_call_operand.vmem [shape: f32[8,1], index: 4, kind: input, shape index: {}]   ;;  %s999_s5 = inlined_call_operand.<no memory space> [shape: f32[1], index: 5, kind: input, shape index: {}]   ;;  %s1000_s6 = inlined_call_operand.hbm [shape: f32[8,256], index: 6, kind: output, shape index: {}]  }
   0x1   :  { %13 = vsyncpa [#allocation9], 0 }
   0x2   :  { %14 = vsyncpa [#allocation7], 0  ;;  %s22_s23 = sshll.u32 %s995_s1, 4  ;;  %s738_s24 = smov [#allocation5]   ;;  %s23_s23 = int_to_ptr.hbm [resolvable:$true] %s22_s23 }
   0x3   :  { %s24_s25 = sshll.u32 %s738_s24, 4  ;;  %s35_s28 = sshll.u32 %s997_s3, 4  ;;  %s25_s25 = int_to_ptr.vmem [resolvable:$true] %s24_s25  ;;  %s36_s28 = int_to_ptr.hbm [resolvable:$true] %s35_s28 }
   0x4   :  { %27 = dma.hbm_to_vmem [thread:$0]  %s23_s23, 128, %s25_s25, [#allocation6]  }
   0x5   :  { %s739_s29 = smov [#allocation8]  }
   0x6   :  { %s37_s30 = sshll.u32 %s739_s29, 4  ;;  %s38_s30 = int_to_ptr.vmem [resolvable:$true] %s37_s30 }
   0x7   :  { %40 = dma.hbm_to_vmem [thread:$0]  %s36_s28, 128, %s38_s30, [#allocation9]  }
   0x8   :  { %732 = dma.done.wait [#allocation6], 128  }
   0x9   :  { %733 = vsyncadd [#allocation6], 4294967168 }
   0xa   :  { %734 = dma.done.wait [#allocation9], 128  }
   0xb   :  { %735 = vsyncadd [#allocation9], 4294967168  ;;  %v740_v0 = vmov 0.0   ;;  %s741_s1 = smov 111   ;;  %s742_s7 = smov 112   ;;  %v799_v1 = vld [vmem:[%s994_s0] sm:$0xff]  ;;  %v57_v7 = vlaneseq  ;;  %v338_v61 = vstv %s999_s5 }
   0xc   :  { %258 = vrot.lane.b32.xlu1 %v740_v0, %s741_s1  ;;  %239 = vrot.lane.b32.xlu2 %v740_v0, %s742_s7  ;;  %v804_v2 = vld [vmem:[%s994_s0 + $0x8] sm:$0xff]  ;;  %s743_s11 = smov 113   ;;  %s744_s12 = smov 127   ;;  %v643_v4 = vpack.i.bf16 %v799_v1, %v740_v0  ;;  %vm260_vm0 = vcmask 908288   ;;  %vm241_vm3 = vcmask 916480   ;;  %vm220_vm4 = vcmask 924672  }
   0xd   :  { %254 = vrot.lane.b32.xlu0 %v799_v1, %s741_s1  ;;  %v638_v3 = vpack.i.bf16 %v804_v2, %v799_v1  ;;  %s745_s0 = smov 1   ;;  %s746_s13 = smov 15   ;;  %v58_v9 = vand.u32 127, %v57_v7  ;;  %vm199_vm7 = vcmask 1039360   ;;  %v92_v35 = vld [vmem:[%s996_s2] sm:$0xff]  ;;  %v749_v38 = vmov 0  }
   0xe   :  { %s747_s14 = smov 16   ;;  %s748_s15 = smov 17   ;;  %648 = vset.pattern.permute.xlu1 %v749_v38  ;;  %659 = vset.pattern.permute.xlu0 %v749_v38  ;;  %vm174_vm8 = vcmask 7168   ;;  %vm153_vm9 = vcmask 121856   ;;  %vm130_vm10 = vcmask 130048   ;;  %vm109_vm11 = vcmask 138240  }
   0xf   :  { %v59_v10 = vadd.s32 128, %v58_v9  ;;  %v64_v14 = vand.u32 15, %v58_v9  ;;  %v91_v54 = vld [vmem:[#allocation5] sm:$0xff]  ;;  %vm292_vm12 = vcmask 588800   ;;  %s586_s23 = sshll.u32 %s1000_s6, 4  ;;  %s587_s23 = int_to_ptr.hbm [resolvable:$true] %s586_s23 }
  0x11   :  { %v71_v15 = vand.u32 15, %v59_v10  ;;  %vm854_vm1 = vcmp.le.s32.totalorder %v64_v14, 14  ;;  %vm870_vm5 = vcmp.ge.s32.totalorder %v64_v14, 1 }
  0x13   :  { %vm858_vm2 = vcmp.le.s32.totalorder %v71_v15, 14  ;;  %vm874_vm6 = vcmp.ge.s32.totalorder %v71_v15, 1 }
  0x14   :  { %214 = vrot.lane.b32.xlu2 %v799_v1, %s743_s11  ;;  %639 = vrot.lane.b32.xlu1 %v638_v3, %s742_s7 }
  0x15   :  { %256 = vrot.lane.b32.xlu0 %v804_v2, %s741_s1 }
  0x1c   :  { %193 = vrot.lane.b32.xlu2 %v799_v1, %s744_s12  ;;  %218 = vrot.lane.b32.xlu1 %v740_v0, %s743_s11 }
  0x1d   :  { %216 = vrot.lane.b32.xlu0 %v804_v2, %s743_s11 }
  0x24   :  { %168 = vrot.lane.b32.xlu2 %v740_v0, %s745_s0  ;;  %197 = vrot.lane.b32.xlu1 %v740_v0, %s744_s12 }
  0x25   :  { %195 = vrot.lane.b32.xlu0 %v804_v2, %s744_s12 }
  0x2c   :  { %147 = vrot.lane.b32.xlu2 %v740_v0, %s746_s13  ;;  %172 = vrot.lane.b32.xlu1 %v804_v2, %s745_s0 }
  0x2d   :  { %170 = vrot.lane.b32.xlu0 %v799_v1, %s745_s0 }
  0x34   :  { %644 = vrot.lane.b32.xlu2 %v643_v4, %s747_s14  ;;  %151 = vrot.lane.b32.xlu1 %v804_v2, %s746_s13 }
  0x35   :  { %149 = vrot.lane.b32.xlu0 %v799_v1, %s746_s13 }
  0x3c   :  { %105 = vrot.lane.b32.xlu2 %v799_v1, %s748_s15  ;;  %103 = vrot.lane.b32.xlu1 %v740_v0, %s748_s15 }
  0x3d   :  { %128 = vrot.lane.b32.xlu0 %v804_v2, %s747_s14 }
  0x44   :  { %289 = vperm.xlu1 %648, %v92_v35  }
  0x45   :  { %107 = vrot.lane.b32.xlu0 %v804_v2, %s748_s15 }
  0x4c   :  { %497 = vrot.lane.b32.xlu1 %v740_v0, %s741_s1 }
  0x4d   :  { %479 = vrot.lane.b32.xlu0 %v740_v0, %s742_s7 }
  0x54   :  { %411 = vrot.lane.b32.xlu1 %v740_v0, %s745_s0 }
  0x55   :  { %459 = vrot.lane.b32.xlu0 %v740_v0, %s743_s11 }
  0x5c   :  { %391 = vrot.lane.b32.xlu1 %v740_v0, %s746_s13 }
  0x5d   :  { %439 = vrot.lane.b32.xlu0 %v740_v0, %s744_s12 }
  0x66   :  { %v240_v5 = vpop.permute.xlu2 %239 }
  0x6e   :  { %v215_v6 = vpop.permute.xlu2 %214 }
  0x76   :  { %v194_v12 = vpop.permute.xlu2 %193 }
  0x7e   :  { %v259_v8 = vpop.permute.xlu1 %258  ;;  %v169_v25 = vpop.permute.xlu2 %168 }
  0x7f   :  { %v255_v11 = vpop.permute.xlu0 %254 }
  0x86   :  { %v640_v13 = vpop.permute.xlu1 %639  ;;  %v148_v33 = vpop.permute.xlu2 %147 }
  0x87   :  { %v641_v16 = vunpack.i.l.bf16 %v640_v13  ;;  %v642_v17 = vunpack.i.h.bf16 %v640_v13  ;;  %v257_v20 = vpop.permute.xlu0 %256 }
  0x88   :  { %v261_v21 = vsel %vm260_vm0, %v255_v11, %v257_v20  ;;  %v262_v22 = vsel %vm260_vm0, %v257_v20, %v259_v8 }
  0x89   :  { %v242_v23 = vsel %vm241_vm3, %v641_v16, %v642_v17  ;;  %601 = vmatpush.msk.msra.mxu0 %vm854_vm1, %v261_v21  ;;  %607 = vmatpush.msk.msra.mxu1 %vm858_vm2, %v262_v22  ;;  %v243_v26 = vsel %vm241_vm3, %v642_v17, %v240_v5 }
  0x8b   :  { %324 = vmatpush.msra.mxu1 %v243_v26  ;;  %304 = vmatpush.msra.mxu0 %v242_v23 }
  0x8e   :  { %v219_v24 = vpop.permute.xlu1 %218  ;;  %v645_v40 = vpop.permute.xlu2 %644 }
  0x8f   :  { %v217_v29 = vpop.permute.xlu0 %216  ;;  %v647_v45 = vunpack.i.h.bf16 %v645_v40  ;;  %v646_v46 = vunpack.i.l.bf16 %v645_v40 }
  0x90   :  { %v221_v30 = vsel %vm220_vm4, %v215_v6, %v217_v29  ;;  %v222_v31 = vsel %vm220_vm4, %v217_v29, %v219_v24 }
  0x91   :  { %602 = vmatpush.msk.msra.mxu0 %vm870_vm5, %v221_v30  ;;  %608 = vmatpush.msk.msra.mxu1 %vm874_vm6, %v222_v31  ;;  %v131_v51 = vsel %vm130_vm10, %v646_v46, %v647_v45 }
  0x96   :  { %v198_v32 = vpop.permute.xlu1 %197  ;;  %v106_v48 = vpop.permute.xlu2 %105 }
  0x97   :  { %v196_v34 = vpop.permute.xlu0 %195 }
  0x98   :  { %v200_v36 = vsel %vm199_vm7, %v194_v12, %v196_v34  ;;  %v201_v37 = vsel %vm199_vm7, %v196_v34, %v198_v32 }
  0x99   :  { %603 = vmatpush.msk.msra.mxu0 %vm854_vm1, %v200_v36  ;;  %609 = vmatpush.msk.msra.mxu1 %vm858_vm2, %v201_v37 }
  0x9b   :  { %307 = vmatpush.msra.mxu0 %v799_v1  ;;  %327 = vmatpush.msra.mxu1 %v804_v2 }
  0x9e   :  { %v173_v39 = vpop.permute.xlu1 %172 }
  0x9f   :  { %v171_v41 = vpop.permute.xlu0 %170 }
  0xa0   :  { %v175_v42 = vsel %vm174_vm8, %v169_v25, %v171_v41  ;;  %v176_v43 = vsel %vm174_vm8, %v171_v41, %v173_v39 }
  0xa1   :  { %604 = vmatpush.msk.msra.mxu0 %vm870_vm5, %v175_v42  ;;  %610 = vmatpush.msk.msra.mxu1 %vm874_vm6, %v176_v43 }
  0xa6   :  { %v152_v44 = vpop.permute.xlu1 %151 }
  0xa7   :  { %v150_v47 = vpop.permute.xlu0 %149 }
  0xa8   :  { %v154_v49 = vsel %vm153_vm9, %v148_v33, %v150_v47  ;;  %v155_v50 = vsel %vm153_vm9, %v150_v47, %v152_v44 }
  0xa9   :  { %605 = vmatpush.msk.msra.mxu0 %vm854_vm1, %v154_v49  ;;  %611 = vmatpush.msk.msra.mxu1 %vm858_vm2, %v155_v50 }
  0xab   :  { %310 = vmatpush.msra.mxu0 %v131_v51 }
  0xae   :  { %v104_v52 = vpop.permute.xlu1 %103 }
  0xaf   :  { %v110_v53 = vsel %vm109_vm11, %v104_v52, %v106_v48  ;;  %v129_v55 = vpop.permute.xlu0 %128 }
  0xb0   :  { %606 = vmatpush.msk.msra.mxu0 %vm870_vm5, %v110_v53  ;;  %v132_v56 = vsel %vm130_vm10, %v647_v45, %v129_v55  ;;  %v345_v53 = vld [vmem:[#allocation8] sm:$0xff] }
  0xb1   :  { %597 = vmatmul.msk.f32.vlgmr.msra.gmra.mxu0 %vm292_vm12, %v91_v54  ;;  %330 = vmatpush.msra.mxu1 %v132_v56 }
  0xb6   :  { %v290_v59 = vpop.permute.xlu1 %289 }
  0xb7   :  { %v108_v57 = vpop.permute.xlu0 %107 }
  0xb8   :  { %v111_v58 = vsel %vm109_vm11, %v106_v48, %v108_v57 }
  0xb9   :  { %612 = vmatpush.msk.msra.mxu1 %vm874_vm6, %v111_v58 }
  0xba   :  { %598 = vmatmul.msk.f32.vlgmr.msra.gmra.mxu1 %vm292_vm12, %v91_v54 }
  0xbe   :  { %v498_v10 = vpop.permute.xlu1 %497 }
  0xbf   :  { %v480_v13 = vpop.permute.xlu0 %479 }
  0xc6   :  { %v412_v11 = vpop.permute.xlu1 %411 }
  0xc7   :  { %v460_v16 = vpop.permute.xlu0 %459 }
  0xce   :  { %v392_v15 = vpop.permute.xlu1 %391 }
  0xcf   :  { %v440_v21 = vpop.permute.xlu0 %439 }
 0x12e   :  { %v313_v60 = vpop.f32.mrf.mxu0 }
 0x12f   :  { %v314_v62 = vadd.f32 %v313_v60, %v290_v59 }
 0x131   :  { %vm336_vm13 = vcmp.gt.f32.partialorder %v314_v62, 0.0  ;;  %v339_v63 = vmul.f32 %v338_v61, %v314_v62 }
 0x133   :  { %v341_v3 = vsel %vm336_vm13, %v314_v62, %v339_v63 }
 0x134   :  { %455 = vrot.lane.b32.xlu1 %v341_v3, %s743_s11  ;;  %493 = vrot.lane.b32.xlu2 %v341_v3, %s741_s1  ;;  %v654_v9 = vpack.i.bf16 %v341_v3, %v740_v0 }
 0x137   :  { %v333_v4 = vpop.f32.mrf.mxu1 }
 0x138   :  { %v334_v5 = vadd.f32 %v333_v4, %v290_v59 }
 0x13a   :  { %vm337_vm14 = vcmp.gt.f32.partialorder %v334_v5, 0.0  ;;  %v340_v6 = vmul.f32 %v338_v61, %v334_v5 }
 0x13c   :  { %435 = vrot.lane.b32.xlu1 %v341_v3, %s744_s12  ;;  %v342_v7 = vsel %vm337_vm14, %v334_v5, %v340_v6 }
 0x13d   :  { %495 = vrot.lane.b32.xlu0 %v342_v7, %s741_s1  ;;  %v649_v8 = vpack.i.bf16 %v342_v7, %v341_v3 }
 0x13f   :  { %650 = vrot.lane.b32.xlu2 %v649_v8, %s742_s7 }
 0x144   :  { %655 = vrot.lane.b32.xlu1 %v654_v9, %s747_s14 }
 0x145   :  { %415 = vrot.lane.b32.xlu0 %v342_v7, %s745_s0 }
 0x147   :  { %457 = vrot.lane.b32.xlu2 %v342_v7, %s743_s11 }
 0x14c   :  { %355 = vrot.lane.b32.xlu1 %v341_v3, %s748_s15 }
 0x14d   :  { %395 = vrot.lane.b32.xlu0 %v342_v7, %s746_s13 }
 0x14f   :  { %437 = vrot.lane.b32.xlu2 %v342_v7, %s744_s12 }
 0x155   :  { %353 = vrot.lane.b32.xlu0 %v740_v0, %s748_s15  ;;  %v346_v0 = vld [vmem:[%s998_s4] sm:$0xff]  ;;  %s750_s4 = smov [#allocation10]  }
 0x156   :  { %s584_s20 = sshll.u32 %s750_s4, 4  ;;  %s585_s20 = int_to_ptr.vmem [resolvable:$true] %s584_s20 }
 0x157   :  { %413 = vrot.lane.b32.xlu2 %v341_v3, %s745_s0 }
 0x15d   :  { %527 = vperm.xlu0 %659, %v346_v0  }
 0x15f   :  { %393 = vrot.lane.b32.xlu2 %v341_v3, %s746_s13 }
 0x167   :  { %377 = vrot.lane.b32.xlu2 %v342_v7, %s747_s14 }
 0x16f   :  { %357 = vrot.lane.b32.xlu2 %v342_v7, %s748_s15 }
 0x18e   :  { %v494_v12 = vpop.permute.xlu2 %493 }
 0x199   :  { %v651_v14 = vpop.permute.xlu2 %650 }
 0x19a   :  { %v653_v24 = vunpack.i.h.bf16 %v651_v14  ;;  %v652_v25 = vunpack.i.l.bf16 %v651_v14 }
 0x19c   :  { %v481_v32 = vsel %vm241_vm3, %v652_v25, %v653_v24  ;;  %v482_v33 = vsel %vm241_vm3, %v653_v24, %v480_v13 }
 0x1a1   :  { %v458_v17 = vpop.permute.xlu2 %457 }
 0x1a2   :  { %v462_v35 = vsel %vm220_vm4, %v458_v17, %v460_v16 }
 0x1a6   :  { %v456_v20 = vpop.permute.xlu1 %455 }
 0x1a7   :  { %v461_v34 = vsel %vm220_vm4, %v456_v20, %v458_v17 }
 0x1a9   :  { %v438_v22 = vpop.permute.xlu2 %437 }
 0x1aa   :  { %v442_v37 = vsel %vm199_vm7, %v438_v22, %v440_v21 }
 0x1ae   :  { %v436_v23 = vpop.permute.xlu1 %435 }
 0x1af   :  { %v496_v26 = vpop.permute.xlu0 %495  ;;  %v441_v36 = vsel %vm199_vm7, %v436_v23, %v438_v22 }
 0x1b0   :  { %v499_v29 = vsel %vm260_vm0, %v494_v12, %v496_v26  ;;  %v500_v30 = vsel %vm260_vm0, %v496_v26, %v498_v10 }
 0x1b1   :  { %v414_v31 = vpop.permute.xlu2 %413  ;;  %613 = vmatpush.msk.msra.mxu2 %vm854_vm1, %v499_v29  ;;  %619 = vmatpush.msk.msra.mxu3 %vm858_vm2, %v500_v30 }
 0x1b2   :  { %v417_v43 = vsel %vm174_vm8, %v412_v11, %v414_v31 }
 0x1b3   :  { %541 = vmatpush.msra.mxu2 %v481_v32  ;;  %561 = vmatpush.msra.mxu3 %v482_v33 }
 0x1b5   :  { %614 = vmatpush.msk.msra.mxu2 %vm870_vm5, %v461_v34  ;;  %620 = vmatpush.msk.msra.mxu3 %vm874_vm6, %v462_v35 }
 0x1b6   :  { %v656_v38 = vpop.permute.xlu1 %655 }
 0x1b7   :  { %615 = vmatpush.msk.msra.mxu2 %vm854_vm1, %v441_v36  ;;  %621 = vmatpush.msk.msra.mxu3 %vm858_vm2, %v442_v37  ;;  %v416_v39 = vpop.permute.xlu0 %415  ;;  %v658_v41 = vunpack.i.h.bf16 %v656_v38  ;;  %v657_v42 = vunpack.i.l.bf16 %v656_v38 }
 0x1b8   :  { %v418_v44 = vsel %vm174_vm8, %v414_v31, %v416_v39 }
 0x1b9   :  { %v394_v40 = vpop.permute.xlu2 %393  ;;  %544 = vmatpush.msra.mxu2 %v341_v3  ;;  %564 = vmatpush.msra.mxu3 %v342_v7  ;;  %v379_v46 = vsel %vm130_vm10, %v657_v42, %v658_v41 }
 0x1ba   :  { %v397_v45 = vsel %vm153_vm9, %v392_v15, %v394_v40 }
 0x1bb   :  { %616 = vmatpush.msk.msra.mxu2 %vm870_vm5, %v417_v43  ;;  %622 = vmatpush.msk.msra.mxu3 %vm874_vm6, %v418_v44 }
 0x1bd   :  { %617 = vmatpush.msk.msra.mxu2 %vm854_vm1, %v397_v45 }
 0x1be   :  { %v356_v51 = vpop.permute.xlu1 %355 }
 0x1bf   :  { %547 = vmatpush.msra.mxu2 %v379_v46  ;;  %v396_v47 = vpop.permute.xlu0 %395 }
 0x1c0   :  { %v398_v48 = vsel %vm153_vm9, %v394_v40, %v396_v47 }
 0x1c1   :  { %v378_v49 = vpop.permute.xlu2 %377  ;;  %623 = vmatpush.msk.msra.mxu3 %vm858_vm2, %v398_v48 }
 0x1c2   :  { %v380_v50 = vsel %vm130_vm10, %v658_v41, %v378_v49 }
 0x1c3   :  { %567 = vmatpush.msra.mxu3 %v380_v50 }
 0x1c7   :  { %v354_v52 = vpop.permute.xlu0 %353 }
 0x1c8   :  { %v359_v54 = vsel %vm109_vm11, %v354_v52, %v356_v51 }
 0x1c9   :  { %v358_v18 = vpop.permute.xlu2 %357  ;;  %618 = vmatpush.msk.msra.mxu2 %vm870_vm5, %v359_v54 }
 0x1ca   :  { %v360_v55 = vsel %vm109_vm11, %v356_v51, %v358_v18  ;;  %599 = vmatmul.msk.f32.vlgmr.msra.gmra.mxu2 %vm292_vm12, %v345_v53 }
 0x1cb   :  { %624 = vmatpush.msk.msra.mxu3 %vm874_vm6, %v360_v55 }
 0x1cc   :  { %600 = vmatmul.msk.f32.vlgmr.msra.gmra.mxu3 %vm292_vm12, %v345_v53 }
 0x1cf   :  { %v528_v19 = vpop.permute.xlu0 %527 }
 0x24d   :  { %v550_v56 = vpop.f32.mrf.mxu2 }
 0x24e   :  { %v551_v57 = vadd.f32 %v550_v56, %v528_v19 }
 0x24f   :  { %v570_v58 = vpop.f32.mrf.mxu3 }
 0x250   :  { %v571_v59 = vadd.f32 %v570_v58, %v528_v19  ;;  %v573_v60 = vadd.f32 %v551_v57, %v799_v1 }
 0x252   :  { %v574_v27 = vadd.f32 %v571_v59, %v804_v2  ;;  %v575_v61 = vmax.f32 %v573_v60, 0.0 }
 0x254   :  { %v576_v28 = vmax.f32 %v574_v27, 0.0  ;;  %577 = vst [vmem:[#allocation10] sm:$0xff] %v575_v61 }
 0x256   :  { %578 = vst [vmem:[#allocation10 + $0x8] sm:$0xff] %v576_v28 }
 0x257   :  { %589 = dma.vmem_to_hbm [thread:$0]  %s585_s20, 256, %s587_s23, [#allocation7]  }
 0x258   :  { %736 = dma.done.wait [#allocation7], 256  }
 0x259   :  { %737 = vsyncadd [#allocation7], 4294967040 }
 0x25a   :  { %594 = vsyncpa [#allocation6], 1 }
 0x25b   :  { %595 = vsyncpa [#allocation9], 1 }
 0x25c   :  { %596 = vsyncpa [#allocation7], 1 }

</bundles_post_ra>
